<compile_context>
chip_gen: v7x
topology: tpu7x:2x2x1
jax: 0.10.0
libtpu: 0.0.40
codegen_flags: <defaults>
</compile_context>

<pallas_src>
import functools
import math

import jax
import jax.numpy as jnp
from jax.experimental import pallas as pl
from jax.experimental.pallas import tpu as pltpu


def _sdpa_kernel(q_ref, k_ref, v_ref, o_ref, *, inv_temperature):
    # Blocks are (TB, N, d); keep MXU operands in the input dtype (bf16 stays bf16).
    q = q_ref[...]
    k = k_ref[...]
    v = v_ref[...]

    # scores = q @ k^T, contracting the feature dim directly (no transpose),
    # f32 accumulation on the MXU.  -> [TB, N, N]
    s = jnp.einsum("bnd,bmd->bnm", q, k, preferred_element_type=jnp.float32)

    # Numerically-stable softmax in f32, with the 1/temperature scale folded in:
    # softmax(s / t) == exp((s - max(s)) / t) / sum(...)   (t > 0).
    m = jnp.max(s, axis=-1, keepdims=True)
    e = jnp.exp((s - m) * inv_temperature)
    denom = jnp.sum(e, axis=-1, keepdims=True)

    # dropout is identity at inference time.

    # Unnormalized output = e @ v (second MXU matmul in the input dtype),
    # then normalize the [N, d_v] output (reciprocal-multiply) instead of the
    # [N, N] score matrix.
    out = jnp.einsum(
        "bnm,bmd->bnd", e.astype(v.dtype), v, preferred_element_type=jnp.float32
    )
    out = out * pl.reciprocal(denom)

    o_ref[...] = out.astype(o_ref.dtype)


def _pick_batch_tile(B, N, d_k, d_vp, in_itemsize, budget_bytes):
    """Largest divisor TB of B whose (double-buffered) tiles + f32 scratch fit."""
    best = 1
    for tb in range(1, B + 1):
        if B % tb:
            continue
        io = 2 * tb * N * (2 * d_k + 2 * d_vp) * in_itemsize  # q,k,v,o double-buffered
        scratch = 3 * tb * N * N * 4 + 2 * tb * N * d_vp * 4  # f32 scores/exp/out
        if io + scratch <= budget_bytes:
            best = tb
    return best


def scaled_dot_product_attention(q, k, v, temperature, attn_dropout=0.0):
    """q: [B, N, d_k], k: [B, N, d_k], v: [B, N, d_v] -> [B, N, d_v]."""
    del attn_dropout  # inference: dropout is identity
    B, N, d_k = q.shape
    _, _, d_v = v.shape

    # Lane-dense output: pad d_v up to a multiple of 128 so the output block fills
    # the 128-lane vregs and HBM stores are unmasked. Exact: padded v columns are
    # zero, so the corresponding output columns are zero and are sliced off below.
    pad = (-d_v) % 128
    v_in = jnp.pad(v, ((0, 0), (0, 0), (0, pad))) if pad else v
    d_vp = d_v + pad

    in_itemsize = jnp.dtype(q.dtype).itemsize
    tb = _pick_batch_tile(
        B, N, d_k, d_vp, in_itemsize, budget_bytes=36 * 1024 * 1024
    )

    kernel = functools.partial(_sdpa_kernel, inv_temperature=1.0 / float(temperature))

    cost = pl.CostEstimate(
        flops=2 * B * N * N * (d_k + d_vp),
        transcendentals=B * N * N,
        bytes_accessed=(q.size + k.size + v_in.size) * in_itemsize
        + B * N * d_vp * in_itemsize,
    )

    out = pl.pallas_call(
        kernel,
        out_shape=jax.ShapeDtypeStruct((B, N, d_vp), q.dtype),
        grid_spec=pltpu.PrefetchScalarGridSpec(
            num_scalar_prefetch=0,
            grid=(B // tb,),
            in_specs=[
                pl.BlockSpec((tb, N, d_k), lambda b: (b, 0, 0)),
                pl.BlockSpec((tb, N, d_k), lambda b: (b, 0, 0)),
                pl.BlockSpec((tb, N, d_vp), lambda b: (b, 0, 0)),
            ],
            out_specs=pl.BlockSpec((tb, N, d_vp), lambda b: (b, 0, 0)),
        ),
        compiler_params=pltpu.CompilerParams(
            dimension_semantics=("parallel",),
            vmem_limit_bytes=48 * 1024 * 1024,
        ),
        cost_estimate=cost,
    )(q, k, v_in)

    return out[:, :, :d_v] if pad else out


def _reference(q, k, v, temperature):
    s = jnp.einsum("bnd,bmd->bnm", q / temperature, k)
    p = jax.nn.softmax(s, axis=-1)
    return jnp.einsum("bnm,bmd->bnd", p, v)


if __name__ == "__main__":
    # Small shapes consistent with the module: batch=2, num_grids(seq)=8, d_k=d_v=32
    B, N, d_k, d_v = 2, 8, 32, 32
    temperature = math.sqrt(d_k)

    key = jax.random.PRNGKey(0)
    kq, kk, kv = jax.random.split(key, 3)
    q = jax.random.normal(kq, (B, N, d_k), dtype=jnp.float32)
    k = jax.random.normal(kk, (B, N, d_k), dtype=jnp.float32)
    v = jax.random.normal(kv, (B, N, d_v), dtype=jnp.float32)

    out = scaled_dot_product_attention(q, k, v, temperature, attn_dropout=0.1)
    out = jax.block_until_ready(out)

    ref = _reference(q, k, v, temperature)
    assert out.shape == (B, N, d_v)
    assert jnp.allclose(out, ref, atol=1e-5, rtol=1e-5), "mismatch vs reference"

    print("KERNEL_OK")
</pallas_src>

<mosaic_0001>
module attributes {stable_mosaic.version = 11 : i64} {
  func.func @_sdpa_kernel(%arg0: i32, %arg1: memref<2x8x32xf32, #tpu.memory_space<vmem>>, %arg2: memref<2x8x32xf32, #tpu.memory_space<vmem>>, %arg3: memref<2x8x128xf32, #tpu.memory_space<vmem>>, %arg4: memref<2x8x128xf32, #tpu.memory_space<vmem>>) attributes {dimension_semantics = [#tpu.dimension_semantics<parallel>], iteration_bounds = array<i64: 1>, scalar_prefetch = 0 : i64, scratch_operands = 0 : i64, tpu.core_type = #tpu.core_type<tc>, window_params = [{transform_indices = @transform_0, window_bounds = array<i64: 2, 8, 32>}, {transform_indices = @transform_1, window_bounds = array<i64: 2, 8, 32>}, {transform_indices = @transform_2, window_bounds = array<i64: 2, 8, 128>}, {transform_indices = @transform_3, window_bounds = array<i64: 2, 8, 128>}]} {
    %c0 = arith.constant 0 : index
    %c0_0 = arith.constant 0 : index
    %c0_1 = arith.constant 0 : index
    %0 = vector.load %arg1[%c0, %c0_0, %c0_1] : memref<2x8x32xf32, #tpu.memory_space<vmem>>, vector<2x8x32xf32>
    %c0_2 = arith.constant 0 : index
    %c0_3 = arith.constant 0 : index
    %c0_4 = arith.constant 0 : index
    %1 = vector.load %arg2[%c0_2, %c0_3, %c0_4] : memref<2x8x32xf32, #tpu.memory_space<vmem>>, vector<2x8x32xf32>
    %c0_5 = arith.constant 0 : index
    %c0_6 = arith.constant 0 : index
    %c0_7 = arith.constant 0 : index
    %2 = vector.load %arg3[%c0_5, %c0_6, %c0_7] : memref<2x8x128xf32, #tpu.memory_space<vmem>>, vector<2x8x128xf32>
    "tpu.trace_start"() <{level = 10 : i32, message = "bnd,bmd->bnm"}> : () -> ()
    %cst = arith.constant dense<0.000000e+00> : vector<2x8x8xf32>
    %3 = tpu.matmul %0, %1, %cst {dimension_numbers = #tpu.dot_dimension_numbers<[2], [2], [1], [1], [0, 0, 0, 1, 1, 1], [0], [0]>} : vector<2x8x32xf32>, vector<2x8x32xf32>, vector<2x8x8xf32> -> vector<2x8x8xf32>
    "tpu.trace_stop"() : () -> ()
    %cst_8 = arith.constant dense<0xFF800000> : vector<2x8xf32>
    %4 = vector.multi_reduction <maximumf>, %3, %cst_8 [2] : vector<2x8x8xf32> to vector<2x8xf32>
    %5 = vector.shape_cast %4 : vector<2x8xf32> to vector<2x8x1xf32>
    %6 = vector.broadcast %5 : vector<2x8x1xf32> to vector<2x8x8xf32>
    %7 = arith.subf %3, %6 : vector<2x8x8xf32>
    %cst_9 = arith.constant 0.176776692 : f32
    %8 = vector.broadcast %cst_9 : f32 to vector<2x8x8xf32>
    %9 = arith.mulf %7, %8 : vector<2x8x8xf32>
    %10 = math.exp %9 : vector<2x8x8xf32>
    %cst_10 = arith.constant dense<0.000000e+00> : vector<2x8xf32>
    %11 = vector.multi_reduction <add>, %10, %cst_10 [2] : vector<2x8x8xf32> to vector<2x8xf32>
    %12 = vector.shape_cast %11 : vector<2x8xf32> to vector<2x8x1xf32>
    "tpu.trace_start"() <{level = 10 : i32, message = "bnm,bmd->bnd"}> : () -> ()
    %cst_11 = arith.constant dense<0.000000e+00> : vector<2x8x128xf32>
    %13 = tpu.matmul %10, %2, %cst_11 {dimension_numbers = #tpu.dot_dimension_numbers<[2], [1], [1], [2], [0, 0, 0, 1, 1, 2], [0], [0]>} : vector<2x8x8xf32>, vector<2x8x128xf32>, vector<2x8x128xf32> -> vector<2x8x128xf32>
    "tpu.trace_stop"() : () -> ()
    %14 = tpu.reciprocal %12 : vector<2x8x1xf32> -> vector<2x8x1xf32>
    %15 = vector.broadcast %14 : vector<2x8x1xf32> to vector<2x8x128xf32>
    %16 = arith.mulf %13, %15 : vector<2x8x128xf32>
    %c0_12 = arith.constant 0 : index
    %c0_13 = arith.constant 0 : index
    %c0_14 = arith.constant 0 : index
    %17 = vector.load %arg4[%c0_12, %c0_13, %c0_14] : memref<2x8x128xf32, #tpu.memory_space<vmem>>, vector<2x8x128xf32>
    tpu.vector_store %arg4[%c0_12, %c0_13, %c0_14], %16 {strides = array<i32>} : memref<2x8x128xf32, #tpu.memory_space<vmem>>, vector<2x8x128xf32>,
    return
  }
  func.func @transform_0(%arg0: i32) -> (i32, i32, i32) {
    %c0_i32 = arith.constant 0 : i32
    %c0_i32_0 = arith.constant 0 : i32
    %c0_i32_1 = arith.constant 0 : i32
    return %arg0, %c0_i32, %c0_i32_0 : i32, i32, i32
  }
  func.func @transform_1(%arg0: i32) -> (i32, i32, i32) {
    %c0_i32 = arith.constant 0 : i32
    %c0_i32_0 = arith.constant 0 : i32
    %c0_i32_1 = arith.constant 0 : i32
    return %arg0, %c0_i32, %c0_i32_0 : i32, i32, i32
  }
  func.func @transform_2(%arg0: i32) -> (i32, i32, i32) {
    %c0_i32 = arith.constant 0 : i32
    %c0_i32_0 = arith.constant 0 : i32
    %c0_i32_1 = arith.constant 0 : i32
    return %arg0, %c0_i32, %c0_i32_0 : i32, i32, i32
  }
  func.func @transform_3(%arg0: i32) -> (i32, i32, i32) {
    %c0_i32 = arith.constant 0 : i32
    %c0_i32_0 = arith.constant 0 : i32
    %c0_i32_1 = arith.constant 0 : i32
    return %arg0, %c0_i32, %c0_i32_0 : i32, i32, i32
  }
}

</mosaic_0001>

<bundles_post_ra>
// kernel: tpu_custom_call.1
= control target key start
LH: loop header
LB: loop body
LE: loop exit
PB: predicated region body
PF: predicated region fallthrough
CT: control target
= control target key end

     0   :  { %8 = vsyncpa [#allocation3], 0  ;;  %s655_s0 = inlined_call_operand.hbm [shape: f32[2,8,32], index: 0, kind: input, shape index: {}]   ;;  %s656_s1 = inlined_call_operand.hbm [shape: f32[2,8,32], index: 1, kind: input, shape index: {}]   ;;  %s657_s2 = inlined_call_operand.hbm [shape: f32[2,8,128], index: 2, kind: input, shape index: {}]   ;;  %s658_s3 = inlined_call_operand.hbm [shape: f32[2,8,128], index: 3, kind: output, shape index: {}]  }
   0x1   :  { %9 = vsyncpa [#allocation6], 0 }
   0x2   :  { %10 = vsyncpa [#allocation4], 0  ;;  %s550_s12 = smov [#allocation5]   ;;  %s551_s14 = smov [#allocation2]  }
   0x3   :  { %s28_s13 = sshll.u32 %s550_s12, 4  ;;  %s16_s15 = sshll.u32 %s551_s14, 4  ;;  %s29_s13 = int_to_ptr.vmem [resolvable:$true] %s28_s13  ;;  %s578_s15 = int_to_ptr.vmem [resolvable:$true] %s16_s15 }
   0x4   :  { %s456_s18 = scalar_lea.hbm %s656_s1, 256 }
   0x5   :  { %p457_p0 = scmp.ne.s32.totalorder %s656_s1, %s456_s18  ;;  %p460_p1 = scmp.lt.u32.totalorder %s456_s18, %s656_s1 }
   0x7   :  { %p462_p2 = pnand %p460_p1, %p457_p0 }
   0x9   :  { %465 = shalt.err (!%p462_p2)
}
   0xa   :  { %s466_s23 = scalar_lea.vmem %s29_s13, 256  ;;  %p471_p4 = scmp.lt.s32.totalorder %s29_s13, %s29_s13 }
   0xb   :  { %p467_p3 = scmp.ne.s32.totalorder %s29_s13, %s466_s23  ;;  %p472_p5 = scmp.lt.s32.totalorder %s466_s23, %s466_s23 }
   0xd   :  { %p473_p6 = por %p472_p5, %p471_p4 }
   0xf   :  { %p474_p7 = pnand %p473_p6, %p467_p3 }
  0x11   :  { %477 = shalt.err (!%p474_p7)
}
  0x12   :  { %s552_s24 = smov 128   ;;  %s553_s25 = smov 8  }
  0x13   :  { %34 = dma.hbm_to_vmem [thread:$0]  %s656_s1, 256, %s29_s13, [#allocation6], %s552_s24, %s552_s24, %s553_s25  }
  0x14   :  { %s478_s30 = scalar_lea.hbm %s655_s0, 256 }
  0x15   :  { %p479_p8 = scmp.ne.s32.totalorder %s655_s0, %s478_s30  ;;  %p482_p9 = scmp.lt.u32.totalorder %s478_s30, %s655_s0 }
  0x17   :  { %p484_p10 = pnand %p482_p9, %p479_p8 }
  0x19   :  { %487 = shalt.err (!%p484_p10)
}
  0x1a   :  { %s488_s8 = scalar_lea.vmem %s578_s15, 256  ;;  %p493_p12 = scmp.lt.s32.totalorder %s578_s15, %s578_s15 }
  0x1b   :  { %p489_p11 = scmp.ne.s32.totalorder %s578_s15, %s488_s8  ;;  %p494_p13 = scmp.lt.s32.totalorder %s488_s8, %s488_s8 }
  0x1d   :  { %p495_p0 = por %p494_p13, %p493_p12 }
  0x1f   :  { %p496_p1 = pnand %p495_p0, %p489_p11 }
  0x21   :  { %499 = shalt.err (!%p496_p1)
}
  0x22   :  { %22 = dma.hbm_to_vmem [thread:$0]  %s655_s0, 256, %s578_s15, [#allocation3], %s552_s24, %s552_s24, %s553_s25  }
  0x23   :  { %s554_s10 = smov [#allocation7]   ;;  %s500_s14 = scalar_lea.hbm %s657_s2, 256 }
  0x24   :  { %s40_s11 = sshll.u32 %s554_s10, 4  ;;  %p501_p2 = scmp.ne.s32.totalorder %s657_s2, %s500_s14  ;;  %s41_s11 = int_to_ptr.vmem [resolvable:$true] %s40_s11 }
  0x25   :  { %p504_p3 = scmp.lt.u32.totalorder %s500_s14, %s657_s2 }
  0x27   :  { %p506_p4 = pnand %p504_p3, %p501_p2 }
  0x29   :  { %509 = shalt.err (!%p506_p4)
}
  0x2a   :  { %s510_s20 = scalar_lea.vmem %s41_s11, 256  ;;  %p515_p6 = scmp.lt.s32.totalorder %s41_s11, %s41_s11 }
  0x2b   :  { %p511_p5 = scmp.ne.s32.totalorder %s41_s11, %s510_s20  ;;  %p516_p7 = scmp.lt.s32.totalorder %s510_s20, %s510_s20 }
  0x2d   :  { %p517_p8 = por %p516_p7, %p515_p6 }
  0x2f   :  { %p518_p9 = pnand %p517_p8, %p511_p5 }
  0x31   :  { %521 = shalt.err (!%p518_p9)
}
  0x32   :  { %46 = dma.hbm_to_vmem [thread:$0]  %s657_s2, 256, %s41_s11, [#allocation6], %s552_s24, %s552_s24, %s553_s25  }
  0x33   :  { %544 = dma.done.wait [#allocation3], 256  }
  0x34   :  { %545 = vsyncadd [#allocation3], 4294967040 }
  0x35   :  { %546 = dma.done.wait [#allocation6], 512  }
  0x36   :  { %547 = vsyncadd [#allocation6], 4294966784  ;;  %v555_v0 = vmov 0.0   ;;  %vm556_vm0 = vmmov 0   ;;  %vm62_vm1 = vcmask 261120   ;;  %v58_v1 = vld [vmem:[#allocation5] sm:$0xff] }
  0x37   :  { %420 = vmatprep.subr.mxu0 %v555_v0  ;;  %422 = vmatprep.mubr.msk.f32.mxu0 %vm556_vm0, %v555_v0  ;;  %v59_v2 = vld [vmem:[#allocation5 + $0x8] sm:$0xff]  ;;  %v56_v3 = vld [vmem:[#allocation2] sm:$0xff]  ;;  %v57_v4 = vld [vmem:[#allocation2 + $0x8] sm:$0xff]  ;;  %vm215_vm2 = vcmask 64512   ;;  %s557_s2 = smov [#allocation8]  }
  0x38   :  { %425 = vmatprep.subr.mxu1 %v555_v0  ;;  %427 = vmatprep.mubr.msk.f32.mxu1 %vm556_vm0, %v555_v0  ;;  %v60_v11 = vld [vmem:[#allocation7] sm:$0xff]  ;;  %v61_v12 = vld [vmem:[#allocation7 + $0x8] sm:$0xff]  ;;  %s393_s21 = sshll.u32 %s557_s2, 4  ;;  %s394_s21 = int_to_ptr.vmem [resolvable:$true] %s393_s21 }
  0x39   :  { %421 = vmatpush3.xpose.msk.msra.mxu0 %vm62_vm1, %v58_v1  ;;  %426 = vmatpush3.xpose.msk.msra.mxu1 %vm62_vm1, %v59_v2  ;;  %s522_s22 = scalar_lea.vmem %s394_s21, 256  ;;  %p527_p11 = scmp.lt.s32.totalorder %s394_s21, %s394_s21 }
  0x3a   :  { %430 = vmatprep.subr.mxu0 %v555_v0  ;;  %435 = vmatprep.subr.mxu1 %v555_v0  ;;  %p523_p10 = scmp.ne.s32.totalorder %s394_s21, %s522_s22  ;;  %p528_p12 = scmp.lt.s32.totalorder %s522_s22, %s522_s22 }
  0x3c   :  { %423 = vmatmul.mubr.msk.f32.vlgmr.msra.gmra.mrb[0].mxu0 %vm62_vm1, %v56_v3  ;;  %428 = vmatmul.mubr.msk.f32.vlgmr.msra.gmra.mrb[0].mxu1 %vm62_vm1, %v57_v4  ;;  %p529_p13 = por %p528_p12, %p527_p11 }
  0x3d   :  { %432 = vmatprep.mubr.msk.f32.mxu0 %vm556_vm0, %v555_v0  ;;  %437 = vmatprep.mubr.msk.f32.mxu1 %vm556_vm0, %v555_v0 }
  0x3e   :  { %431 = vmatpush3.msra.mxu0 %v60_v11  ;;  %436 = vmatpush3.msra.mxu1 %v61_v12  ;;  %p530_p0 = pnand %p529_p13, %p523_p10 }
 0x10f   :  { %v135_v5 = vpop.f32.mrb[0].mxu0  ;;  %v211_v6 = vpop.f32.mrb[0].mxu1 }
 0x110   :  { %v424_v7 = vpop.f32.mrb[1].mxu0  ;;  %v216_v8 = vsel %vm215_vm2, %v135_v5, -inf  ;;  %v429_v9 = vpop.f32.mrb[1].mxu1  ;;  %v219_v10 = vsel %vm215_vm2, %v211_v6, -inf }
 0x111   :  { %217 = vmax.xlane.f32.xlu0 %v216_v8 }
 0x115   :  { %220 = vmax.xlane.f32.xlu0 %v219_v10 }
 0x19e   :  { %v218_v13 = vpop.xlane.xlu0 %217 }
 0x19f   :  { %v222_v14 = vsub.f32 %v135_v5, %v218_v13 }
 0x1a1   :  { %v224_v15 = vmul.f32 0.17677669, %v222_v14 }
 0x1a2   :  { %v221_v16 = vpop.xlane.xlu0 %220 }
 0x1a3   :  { %v226_v17 = vmul.f32 1.442695, %v224_v15  ;;  %v223_v18 = vsub.f32 %v211_v6, %v221_v16 }
 0x1a5   :  { %448 = vpow2.f32 %v226_v17  ;;  %v225_v19 = vmul.f32 0.17677669, %v223_v18 }
 0x1a7   :  { %v228_v20 = vmul.f32 1.442695, %v225_v19 }
 0x1a9   :  { %450 = vpow2.f32 %v228_v20 }
 0x1af   :  { %v449_v21 = vpop.eup %448 }
 0x1b0   :  { %433 = vmatmul.mubr.msk.f32.vlgmr.msra.gmra.mrb[2].mxu0 %vm215_vm2, %v449_v21  ;;  %v230_v22 = vsel %vm215_vm2, %v449_v21, 0.0 }
 0x1b1   :  { %231 = vadd.xlane.f32.xlu1 %v230_v22 }
 0x1b3   :  { %v451_v23 = vpop.eup %450 }
 0x1b4   :  { %438 = vmatmul.mubr.msk.f32.vlgmr.msra.gmra.mrb[2].mxu1 %vm215_vm2, %v451_v23  ;;  %v233_v24 = vsel %vm215_vm2, %v451_v23, 0.0 }
 0x1b5   :  { %234 = vadd.xlane.f32.xlu1 %v233_v24 }
 0x23e   :  { %v232_v25 = vpop.xlane.xlu1 %231 }
 0x23f   :  { %452 = vrcp.f32 %v232_v25 }
 0x242   :  { %v235_v26 = vpop.xlane.xlu1 %234 }
 0x243   :  { %454 = vrcp.f32 %v235_v26 }
 0x249   :  { %v453_v27 = vpop.eup %452 }
 0x24d   :  { %v455_v31 = vpop.eup %454 }
 0x283   :  { %v305_v28 = vpop.f32.mrb[2].mxu0 }
 0x284   :  { %v384_v29 = vmul.f32 %v453_v27, %v305_v28  ;;  %v434_v30 = vpop.f32.mrb[3].mxu0 }
 0x286   :  { %386 = vst [vmem:[#allocation8] sm:$0xff] %v384_v29 }
 0x287   :  { %v378_v32 = vpop.f32.mrb[2].mxu1 }
 0x288   :  { %v385_v33 = vmul.f32 %v455_v31, %v378_v32  ;;  %v439_v34 = vpop.f32.mrb[3].mxu1 }
 0x28a   :  { %387 = vst [vmem:[#allocation8 + $0x8] sm:$0xff] %v385_v33 }
 0x28b   :  { %533 = shalt.err (!%p530_p0)
}
 0x28c   :  { %s534_s27 = scalar_lea.hbm %s658_s3, 256 }
 0x28d   :  { %p535_p1 = scmp.ne.s32.totalorder %s658_s3, %s534_s27  ;;  %p538_p2 = scmp.lt.u32.totalorder %s534_s27, %s658_s3 }
 0x28f   :  { %p540_p3 = pnand %p538_p2, %p535_p1 }
 0x291   :  { %543 = shalt.err (!%p540_p3)
}
 0x292   :  { %399 = dma.vmem_to_hbm [thread:$0]  %s394_s21, 256, %s658_s3, [#allocation4], %s552_s24, %s552_s24, %s553_s25  }
 0x293   :  { %548 = dma.done.wait [#allocation4], 256  }
 0x294   :  { %549 = vsyncadd [#allocation4], 4294967040 }
 0x295   :  { %403 = vsyncpa [#allocation3], 1 }
 0x296   :  { %404 = vsyncpa [#allocation6], 1 }
 0x297   :  { %405 = vsyncpa [#allocation4], 1 }

</bundles_post_ra>
